<compile_context>
chip_gen: v7x
topology: tpu7x:2x2x1
jax: 0.10.0
libtpu: 0.0.40
codegen_flags: <defaults>
</compile_context>

<pallas_src>
import jax
import jax.numpy as jnp
from jax.experimental import pallas as pl
from jax.experimental.pallas import tpu as pltpu


# ----------------------------- Pallas kernel -------------------------------- #

def _apply_bf_kernel(w_ref, x_ref, o_ref):
    # w_ref: (2, M, F_TILE, 1)      stacked [real, imag] weights (F on sublane,
    #                               trailing lane dim of 1 broadcasts over T).
    # x_ref: (2, M, F_TILE, T_TILE) stacked [real, imag] mixture planes.
    # o_ref: (2, F_TILE, T_TILE)    stacked [real, imag] output planes.
    #
    # out = sum_m conj(w_m) * x_m = sum_m (wr - i*wi)(xr + i*xi)
    # Pure VPU multiply-adds: M is 4-8 so an MXU contraction would run at <3%
    # utilization, and the kernel is HBM-bandwidth-bound anyway.  The mic
    # reduction is unrolled so peak live temporaries stay (F_TILE, T_TILE)
    # instead of (M, F_TILE, T_TILE) (de-risks VMEM temp pressure / spills at
    # the larger tiles used on v7x), and weight broadcasts are hoisted once
    # per mic and reused by both output planes.
    n_mics = x_ref.shape[1]
    acc_r = None
    acc_i = None
    for m in range(n_mics):
        xr = x_ref[0, m]                               # (F_TILE, T_TILE)
        xi = x_ref[1, m]
        wr = jnp.broadcast_to(w_ref[0, m], xr.shape)   # hoisted broadcast
        wi = jnp.broadcast_to(w_ref[1, m], xr.shape)
        pr = wr * xr + wi * xi
        pi = wr * xi - wi * xr
        acc_r = pr if acc_r is None else acc_r + pr
        acc_i = pi if acc_i is None else acc_i + pi
    o_ref[0] = acc_r
    o_ref[1] = acc_i


def _aligned_tile(dim, cap, quantum):
    """Tile extent for one axis: the full axis (always a legal block extent)
    if it fits under `cap`, else the largest multiple of `quantum` <= cap.
    Exact divisibility is NOT required: the grid uses pl.cdiv and Pallas masks
    the ragged last block (safe — this kernel is elementwise over F/T)."""
    if dim <= cap:
        return int(dim)
    return int(max(quantum, (cap // quantum) * quantum))


def _vmem_capacity_bytes():
    try:
        return int(pltpu.get_tpu_info().vmem_capacity_bytes)
    except Exception:
        return 64 << 20   # v7x has the smallest physical VMEM; be conservative.


def apply_beamforming_pallas(w_ri, mix_ri, *, f_tile=None, t_tile=None,
                             vmem_limit_bytes=None):
    """Apply the beamforming vector on split real/imag planes.

    Args:
      w_ri:   float32 (B, 2, M, F)     stacked [real, imag] beamforming weights.
      mix_ri: float32 (B, 2, M, F, T)  stacked [real, imag] mixture planes.

    Returns:
      float32 (B, 2, F, T) stacked [real, imag] beamformed output.
    """
    B, two, M, F, T = mix_ri.shape
    assert two == 2 and w_ri.shape == (B, 2, M, F)

    vmem_cap = _vmem_capacity_bytes()

    # --- Generation-aware tile sizing (kernel is purely HBM-bound) ----------
    # Target per-step mixture block ≈ vmem_cap / 8 bytes:
    #   v7x  (64 MiB VMEM, ~3.2 TB/s HBM)  -> ~8 MiB / step
    #   v6e / v5e (128 MiB VMEM)           -> ~16 MiB / step
    # big enough to keep the ~0.35 us fixed per-step overhead <10% of the HBM
    # roofline while the double-buffered pipeline stays well inside VMEM.
    if t_tile is None:
        t_cap = 4096 if vmem_cap >= (96 << 20) else 2048
        t_tile = _aligned_tile(T, t_cap, 128)     # lane-dense (unmasked vst)
    if f_tile is None:
        step_budget = vmem_cap // 8               # bytes per mixture block
        f_cap = step_budget // (2 * M * t_tile * 4)
        f_cap = max(8, (f_cap // 8) * 8)
        f_tile = _aligned_tile(F, min(f_cap, 128), 8)

    # v7x has 2 TensorCores per chip: make sure there are >= 2 blocks along
    # some "parallel" grid axis so megacore sharding has work to split.
    if B == 1 and pl.cdiv(F, f_tile) == 1 and pl.cdiv(T, t_tile) == 1:
        if T > 128:
            t_tile = max(128, (((T + 1) // 2) + 127) // 128 * 128)
        elif F > 8:
            f_tile = max(8, (((F + 1) // 2) + 7) // 8 * 8)

    # Free metadata reshape: F goes to w's sublane axis, trailing lane dim of 1
    # gives a free stride-0 broadcast over T inside the kernel.
    w_ri = w_ri.reshape(B, 2, M, F, 1)

    grid = (B, pl.cdiv(F, f_tile), pl.cdiv(T, t_tile))

    # Scoped-VMEM limit: the default (16 MiB on v5e, 32 MiB on v6e/v7x) can be
    # smaller than the double-buffered blocks chosen above, so set it
    # explicitly (keeping >= 8 MiB physical headroom).
    block_in = 2 * M * f_tile * t_tile * 4
    block_w = 2 * M * f_tile * 4
    block_out = 2 * f_tile * t_tile * 4
    if vmem_limit_bytes is None:
        needed = 2 * (block_in + block_w + block_out)   # double-buffered
        vmem_limit_bytes = int(min(vmem_cap - (8 << 20),
                                   max(32 << 20, needed + (12 << 20))))

    cost = pl.CostEstimate(
        flops=8 * B * M * F * T,
        transcendentals=0,
        bytes_accessed=mix_ri.size * 4 + w_ri.size * 4 + B * 2 * F * T * 4,
    )

    out = pl.pallas_call(
        _apply_bf_kernel,
        out_shape=jax.ShapeDtypeStruct((B, 2, F, T), jnp.float32),
        grid_spec=pltpu.PrefetchScalarGridSpec(
            num_scalar_prefetch=0,
            grid=grid,
            in_specs=[
                pl.BlockSpec((None, 2, M, f_tile, 1),
                             lambda b, f, t: (b, 0, 0, f, 0)),
                pl.BlockSpec((None, 2, M, f_tile, t_tile),
                             lambda b, f, t: (b, 0, 0, f, t)),
            ],
            out_specs=pl.BlockSpec((None, 2, f_tile, t_tile),
                                   lambda b, f, t: (b, 0, f, t)),
        ),
        compiler_params=pltpu.CompilerParams(
            dimension_semantics=("parallel", "parallel", "parallel"),
            vmem_limit_bytes=vmem_limit_bytes),
        cost_estimate=cost,
    )(w_ri, mix_ri)
    return out


# ------------------------------ Forward glue -------------------------------- #

def _condition_scm(x, eps=1e-6):
    """(x + eps*tr(x)/M * I) / (1 + eps) — diagonal loading (asteroid's
    condition_scm), applied unconditionally since the complex64 solve on TPU
    (no complex128 available) is less forgiving than torch's stable_solve."""
    m = x.shape[-1]
    tr = jnp.trace(x, axis1=-2, axis2=-1)[..., None, None]
    eye = jnp.eye(m, dtype=x.dtype)
    return (x + (eps / m) * tr * eye) / (1.0 + eps)


def compute_sdwmwf_vector(target_scm, noise_scm, ref_mic=None, mu=1.0, eps=1e-6):
    """SDW-MWF beamforming vector  w = (Sss + mu*Snn)^{-1} Sss  e_ref.

    Args:
      target_scm: complex64 (B, M, M, F)
      noise_scm:  complex64 (B, M, M, F)
      ref_mic:    None | int | int array (B,)

    Returns:
      complex64 (B, M, F) beamforming vector (conjugated at apply time).
    """
    noise_scm_t = jnp.transpose(noise_scm, (0, 3, 1, 2))     # (B, F, M, M)
    target_scm_t = jnp.transpose(target_scm, (0, 3, 1, 2))   # (B, F, M, M)
    denominator = target_scm_t + mu * noise_scm_t

    # torch.solve(b, a) = a^{-1} b  ->  bf_mat = denominator^{-1} @ target
    # TODO(synk): torch's stable_solve upcasts to complex128; TPU has no native
    # f64, so the tiny (mics x mics) solve stays in complex64 with diagonal
    # loading for stability.
    bf_mat = jnp.linalg.solve(_condition_scm(denominator, eps), target_scm_t)

    if ref_mic is None:
        den = jnp.maximum(
            jnp.real(jnp.einsum('bflm,bfln,bfnm->bm',
                                jnp.conj(bf_mat), noise_scm_t, bf_mat)), eps)
        snr_post = jnp.real(jnp.einsum('bflm,bfln,bfnm->bm',
                                       jnp.conj(bf_mat), target_scm_t, bf_mat)) / den
        batch_mic_idx = jnp.argmax(snr_post, axis=-1)         # (B,)
    elif isinstance(ref_mic, int):
        batch_mic_idx = jnp.full((bf_mat.shape[0],), ref_mic, dtype=jnp.int32)
    else:
        batch_mic_idx = ref_mic

    ref_vects = jax.nn.one_hot(batch_mic_idx, bf_mat.shape[-1],
                               dtype=jnp.float32).astype(bf_mat.dtype)[:, None, :, None]
    bf_vect = jnp.squeeze(jnp.matmul(bf_mat, ref_vects), -1)  # (B, F, M)
    return jnp.swapaxes(bf_vect, -1, -2)                      # (B, M, F)


def sdwmwf_forward_split(mix_ri, target_scm, noise_scm, ref_mic=None, mu=1.0,
                         eps=1e-6, f_tile=None, t_tile=None):
    """SDW-MWF beamformer on a pre-split (real/imag-stacked) mixture.

    mix_ri: float32 (B, 2, M, F, T)  ->  float32 (B, 2, F, T).
    """
    bf_vect = compute_sdwmwf_vector(target_scm, noise_scm, ref_mic, mu, eps)
    w_ri = jnp.stack([jnp.real(bf_vect), jnp.imag(bf_vect)],
                     axis=1).astype(jnp.float32)              # (B, 2, M, F)
    return apply_beamforming_pallas(w_ri, mix_ri, f_tile=f_tile, t_tile=t_tile)


def sdwmwf_forward(mix, target_scm, noise_scm, ref_mic=None, mu=1.0, eps=1e-6):
    """Complex interface matching the PyTorch module.

    mix: complex64 (B, M, F, T) -> complex64 (B, F, T).

    TODO(synk): the complex->planar split below costs one extra HBM pass over
    the mixture (and the final lax.complex one over the output); in deployment
    the producer (STFT) should emit split real/imag planes and use
    sdwmwf_forward_split end-to-end so the op stays purely HBM-roofline-bound.
    """
    mix_ri = jnp.stack([jnp.real(mix), jnp.imag(mix)], axis=1).astype(jnp.float32)
    out_ri = sdwmwf_forward_split(mix_ri, target_scm, noise_scm,
                                  ref_mic=ref_mic, mu=mu, eps=eps)
    return jax.lax.complex(out_ri[:, 0], out_ri[:, 1])


# --------------------------------- Driver ------------------------------------ #

def _crandn(key, shape):
    kr, ki = jax.random.split(key)
    return (jax.random.normal(kr, shape, dtype=jnp.float32)
            + 1j * jax.random.normal(ki, shape, dtype=jnp.float32)).astype(jnp.complex64)


if __name__ == "__main__":
    B, M, F, T = 2, 4, 16, 512

    key = jax.random.PRNGKey(0)
    k_mix, k_s, k_n, k_mix2, k_w2 = jax.random.split(key, 5)

    # Producer emits split real/imag planes directly (no complex->planar HBM pass).
    mix_ri = jax.random.normal(k_mix, (B, 2, M, F, T), dtype=jnp.float32)
    mix_c = jax.lax.complex(mix_ri[:, 0], mix_ri[:, 1])       # reference / wrapper only

    # Hermitian PSD SCMs built as X X^H (in (B, F, M, M)), then permuted to the
    # module's (batch, mics, mics, freqs) input convention.
    Xs = _crandn(k_s, (B, F, M, 8))
    Xn = _crandn(k_n, (B, F, M, 8))
    eye = jnp.eye(M, dtype=jnp.complex64)
    target_scm_t = jnp.einsum('bfmk,bfnk->bfmn', Xs, jnp.conj(Xs))
    noise_scm_t = jnp.einsum('bfmk,bfnk->bfmn', Xn, jnp.conj(Xn)) + 1e-3 * eye
    target_scm = jnp.transpose(target_scm_t, (0, 2, 3, 1))    # (B, M, M, F)
    noise_scm = jnp.transpose(noise_scm_t, (0, 2, 3, 1))      # (B, M, M, F)

    # 1) Main optimized path: split-plane mixture, explicit small tiles so the
    #    demo actually exercises a (B, F-tiles, T-tiles) grid.
    out_ri = sdwmwf_forward_split(mix_ri, target_scm, noise_scm, ref_mic=None,
                                  mu=1.0, f_tile=8, t_tile=128)
    out_ri = jax.block_until_ready(out_ri)
    out = jax.lax.complex(out_ri[:, 0], out_ri[:, 1])
    assert out.shape == (B, F, T) and out.dtype == jnp.complex64

    w_opt = compute_sdwmwf_vector(target_scm, noise_scm, None, 1.0)
    ref = jnp.einsum('bmf,bmft->bft', jnp.conj(w_opt), mix_c)
    assert jnp.allclose(out, ref, rtol=1e-3, atol=1e-3)

    # 2) Ragged-edge path: F not a multiple of 8, T not a multiple of 128 —
    #    tiles stay (8,128)-aligned, pl.cdiv grid + Pallas masking handle the
    #    partial last blocks.
    F2, T2 = 20, 200
    mix_ri2 = jax.random.normal(k_mix2, (B, 2, M, F2, T2), dtype=jnp.float32)
    mix_c2 = jax.lax.complex(mix_ri2[:, 0], mix_ri2[:, 1])
    w2 = jax.random.normal(k_w2, (B, 2, M, F2), dtype=jnp.float32)
    out2 = jax.block_until_ready(
        apply_beamforming_pallas(w2, mix_ri2, f_tile=8, t_tile=128))
    w2_c = jax.lax.complex(w2[:, 0], w2[:, 1])
    ref2 = jnp.einsum('bmf,bmft->bft', jnp.conj(w2_c), mix_c2)
    ref2_ri = jnp.stack([jnp.real(ref2), jnp.imag(ref2)], axis=1)
    assert jnp.allclose(out2, ref2_ri, rtol=1e-3, atol=1e-3)

    # 3) Complex-interface wrapper (module-equivalent signature), default
    #    generation-aware tile selection.
    out_c = jax.block_until_ready(
        sdwmwf_forward(mix_c, target_scm, noise_scm, ref_mic=0, mu=1.0))
    assert out_c.shape == (B, F, T) and out_c.dtype == jnp.complex64
    w0 = compute_sdwmwf_vector(target_scm, noise_scm, 0, 1.0)
    ref0 = jnp.einsum('bmf,bmft->bft', jnp.conj(w0), mix_c)
    assert jnp.allclose(out_c, ref0, rtol=1e-3, atol=1e-3)

    print("KERNEL_OK")
</pallas_src>

<mosaic_0001>
module attributes {stable_mosaic.version = 11 : i64} {
  func.func @_apply_bf_kernel(%arg0: i32, %arg1: i32, %arg2: i32, %arg3: memref<1x2x4x8x1xf32, #tpu.memory_space<vmem>>, %arg4: memref<1x2x4x8x128xf32, #tpu.memory_space<vmem>>, %arg5: memref<1x2x8x128xf32, #tpu.memory_space<vmem>>) attributes {dimension_semantics = [#tpu.dimension_semantics<parallel>, #tpu.dimension_semantics<parallel>, #tpu.dimension_semantics<parallel>], iteration_bounds = array<i64: 2, 2, 4>, scalar_prefetch = 0 : i64, scratch_operands = 0 : i64, tpu.core_type = #tpu.core_type<tc>, window_params = [{transform_indices = @transform_0, window_bounds = array<i64: 1, 2, 4, 8, 1>}, {transform_indices = @transform_1, window_bounds = array<i64: 1, 2, 4, 8, 128>}, {transform_indices = @transform_2, window_bounds = array<i64: 1, 2, 8, 128>}]} {
    %c0 = arith.constant 0 : index
    %c0_0 = arith.constant 0 : index
    %c0_1 = arith.constant 0 : index
    %c0_2 = arith.constant 0 : index
    %c0_3 = arith.constant 0 : index
    %0 = vector.load %arg4[%c0, %c0_0, %c0_1, %c0_2, %c0_3] : memref<1x2x4x8x128xf32, #tpu.memory_space<vmem>>, vector<1x1x1x8x128xf32>
    %1 = vector.shape_cast %0 : vector<1x1x1x8x128xf32> to vector<8x128xf32>
    %c0_4 = arith.constant 0 : index
    %c1 = arith.constant 1 : index
    %c0_5 = arith.constant 0 : index
    %c0_6 = arith.constant 0 : index
    %c0_7 = arith.constant 0 : index
    %2 = vector.load %arg4[%c0_4, %c1, %c0_5, %c0_6, %c0_7] : memref<1x2x4x8x128xf32, #tpu.memory_space<vmem>>, vector<1x1x1x8x128xf32>
    %3 = vector.shape_cast %2 : vector<1x1x1x8x128xf32> to vector<8x128xf32>
    %c0_8 = arith.constant 0 : index
    %c0_9 = arith.constant 0 : index
    %c0_10 = arith.constant 0 : index
    %c0_11 = arith.constant 0 : index
    %c0_12 = arith.constant 0 : index
    %4 = vector.load %arg3[%c0_8, %c0_9, %c0_10, %c0_11, %c0_12] : memref<1x2x4x8x1xf32, #tpu.memory_space<vmem>>, vector<1x1x1x8x1xf32>
    %5 = vector.shape_cast %4 : vector<1x1x1x8x1xf32> to vector<8x1xf32>
    %6 = vector.shape_cast %5 : vector<8x1xf32> to vector<8x1xf32>
    %7 = vector.broadcast %6 : vector<8x1xf32> to vector<8x128xf32>
    %c0_13 = arith.constant 0 : index
    %c1_14 = arith.constant 1 : index
    %c0_15 = arith.constant 0 : index
    %c0_16 = arith.constant 0 : index
    %c0_17 = arith.constant 0 : index
    %8 = vector.load %arg3[%c0_13, %c1_14, %c0_15, %c0_16, %c0_17] : memref<1x2x4x8x1xf32, #tpu.memory_space<vmem>>, vector<1x1x1x8x1xf32>
    %9 = vector.shape_cast %8 : vector<1x1x1x8x1xf32> to vector<8x1xf32>
    %10 = vector.shape_cast %9 : vector<8x1xf32> to vector<8x1xf32>
    %11 = vector.broadcast %10 : vector<8x1xf32> to vector<8x128xf32>
    %12 = arith.mulf %7, %1 : vector<8x128xf32>
    %13 = arith.mulf %11, %3 : vector<8x128xf32>
    %14 = arith.addf %12, %13 : vector<8x128xf32>
    %15 = arith.mulf %7, %3 : vector<8x128xf32>
    %16 = arith.mulf %11, %1 : vector<8x128xf32>
    %17 = arith.subf %15, %16 : vector<8x128xf32>
    %c0_18 = arith.constant 0 : index
    %c0_19 = arith.constant 0 : index
    %c1_20 = arith.constant 1 : index
    %c0_21 = arith.constant 0 : index
    %c0_22 = arith.constant 0 : index
    %18 = vector.load %arg4[%c0_18, %c0_19, %c1_20, %c0_21, %c0_22] : memref<1x2x4x8x128xf32, #tpu.memory_space<vmem>>, vector<1x1x1x8x128xf32>
    %19 = vector.shape_cast %18 : vector<1x1x1x8x128xf32> to vector<8x128xf32>
    %c0_23 = arith.constant 0 : index
    %c1_24 = arith.constant 1 : index
    %c1_25 = arith.constant 1 : index
    %c0_26 = arith.constant 0 : index
    %c0_27 = arith.constant 0 : index
    %20 = vector.load %arg4[%c0_23, %c1_24, %c1_25, %c0_26, %c0_27] : memref<1x2x4x8x128xf32, #tpu.memory_space<vmem>>, vector<1x1x1x8x128xf32>
    %21 = vector.shape_cast %20 : vector<1x1x1x8x128xf32> to vector<8x128xf32>
    %c0_28 = arith.constant 0 : index
    %c0_29 = arith.constant 0 : index
    %c1_30 = arith.constant 1 : index
    %c0_31 = arith.constant 0 : index
    %c0_32 = arith.constant 0 : index
    %22 = vector.load %arg3[%c0_28, %c0_29, %c1_30, %c0_31, %c0_32] : memref<1x2x4x8x1xf32, #tpu.memory_space<vmem>>, vector<1x1x1x8x1xf32>
    %23 = vector.shape_cast %22 : vector<1x1x1x8x1xf32> to vector<8x1xf32>
    %24 = vector.shape_cast %23 : vector<8x1xf32> to vector<8x1xf32>
    %25 = vector.broadcast %24 : vector<8x1xf32> to vector<8x128xf32>
    %c0_33 = arith.constant 0 : index
    %c1_34 = arith.constant 1 : index
    %c1_35 = arith.constant 1 : index
    %c0_36 = arith.constant 0 : index
    %c0_37 = arith.constant 0 : index
    %26 = vector.load %arg3[%c0_33, %c1_34, %c1_35, %c0_36, %c0_37] : memref<1x2x4x8x1xf32, #tpu.memory_space<vmem>>, vector<1x1x1x8x1xf32>
    %27 = vector.shape_cast %26 : vector<1x1x1x8x1xf32> to vector<8x1xf32>
    %28 = vector.shape_cast %27 : vector<8x1xf32> to vector<8x1xf32>
    %29 = vector.broadcast %28 : vector<8x1xf32> to vector<8x128xf32>
    %30 = arith.mulf %25, %19 : vector<8x128xf32>
    %31 = arith.mulf %29, %21 : vector<8x128xf32>
    %32 = arith.addf %30, %31 : vector<8x128xf32>
    %33 = arith.mulf %25, %21 : vector<8x128xf32>
    %34 = arith.mulf %29, %19 : vector<8x128xf32>
    %35 = arith.subf %33, %34 : vector<8x128xf32>
    %36 = arith.addf %14, %32 : vector<8x128xf32>
    %37 = arith.addf %17, %35 : vector<8x128xf32>
    %c0_38 = arith.constant 0 : index
    %c0_39 = arith.constant 0 : index
    %c2 = arith.constant 2 : index
    %c0_40 = arith.constant 0 : index
    %c0_41 = arith.constant 0 : index
    %38 = vector.load %arg4[%c0_38, %c0_39, %c2, %c0_40, %c0_41] : memref<1x2x4x8x128xf32, #tpu.memory_space<vmem>>, vector<1x1x1x8x128xf32>
    %39 = vector.shape_cast %38 : vector<1x1x1x8x128xf32> to vector<8x128xf32>
    %c0_42 = arith.constant 0 : index
    %c1_43 = arith.constant 1 : index
    %c2_44 = arith.constant 2 : index
    %c0_45 = arith.constant 0 : index
    %c0_46 = arith.constant 0 : index
    %40 = vector.load %arg4[%c0_42, %c1_43, %c2_44, %c0_45, %c0_46] : memref<1x2x4x8x128xf32, #tpu.memory_space<vmem>>, vector<1x1x1x8x128xf32>
    %41 = vector.shape_cast %40 : vector<1x1x1x8x128xf32> to vector<8x128xf32>
    %c0_47 = arith.constant 0 : index
    %c0_48 = arith.constant 0 : index
    %c2_49 = arith.constant 2 : index
    %c0_50 = arith.constant 0 : index
    %c0_51 = arith.constant 0 : index
    %42 = vector.load %arg3[%c0_47, %c0_48, %c2_49, %c0_50, %c0_51] : memref<1x2x4x8x1xf32, #tpu.memory_space<vmem>>, vector<1x1x1x8x1xf32>
    %43 = vector.shape_cast %42 : vector<1x1x1x8x1xf32> to vector<8x1xf32>
    %44 = vector.shape_cast %43 : vector<8x1xf32> to vector<8x1xf32>
    %45 = vector.broadcast %44 : vector<8x1xf32> to vector<8x128xf32>
    %c0_52 = arith.constant 0 : index
    %c1_53 = arith.constant 1 : index
    %c2_54 = arith.constant 2 : index
    %c0_55 = arith.constant 0 : index
    %c0_56 = arith.constant 0 : index
    %46 = vector.load %arg3[%c0_52, %c1_53, %c2_54, %c0_55, %c0_56] : memref<1x2x4x8x1xf32, #tpu.memory_space<vmem>>, vector<1x1x1x8x1xf32>
    %47 = vector.shape_cast %46 : vector<1x1x1x8x1xf32> to vector<8x1xf32>
    %48 = vector.shape_cast %47 : vector<8x1xf32> to vector<8x1xf32>
    %49 = vector.broadcast %48 : vector<8x1xf32> to vector<8x128xf32>
    %50 = arith.mulf %45, %39 : vector<8x128xf32>
    %51 = arith.mulf %49, %41 : vector<8x128xf32>
    %52 = arith.addf %50, %51 : vector<8x128xf32>
    %53 = arith.mulf %45, %41 : vector<8x128xf32>
    %54 = arith.mulf %49, %39 : vector<8x128xf32>
    %55 = arith.subf %53, %54 : vector<8x128xf32>
    %56 = arith.addf %36, %52 : vector<8x128xf32>
    %57 = arith.addf %37, %55 : vector<8x128xf32>
    %c0_57 = arith.constant 0 : index
    %c0_58 = arith.constant 0 : index
    %c3 = arith.constant 3 : index
    %c0_59 = arith.constant 0 : index
    %c0_60 = arith.constant 0 : index
    %58 = vector.load %arg4[%c0_57, %c0_58, %c3, %c0_59, %c0_60] : memref<1x2x4x8x128xf32, #tpu.memory_space<vmem>>, vector<1x1x1x8x128xf32>
    %59 = vector.shape_cast %58 : vector<1x1x1x8x128xf32> to vector<8x128xf32>
    %c0_61 = arith.constant 0 : index
    %c1_62 = arith.constant 1 : index
    %c3_63 = arith.constant 3 : index
    %c0_64 = arith.constant 0 : index
    %c0_65 = arith.constant 0 : index
    %60 = vector.load %arg4[%c0_61, %c1_62, %c3_63, %c0_64, %c0_65] : memref<1x2x4x8x128xf32, #tpu.memory_space<vmem>>, vector<1x1x1x8x128xf32>
    %61 = vector.shape_cast %60 : vector<1x1x1x8x128xf32> to vector<8x128xf32>
    %c0_66 = arith.constant 0 : index
    %c0_67 = arith.constant 0 : index
    %c3_68 = arith.constant 3 : index
    %c0_69 = arith.constant 0 : index
    %c0_70 = arith.constant 0 : index
    %62 = vector.load %arg3[%c0_66, %c0_67, %c3_68, %c0_69, %c0_70] : memref<1x2x4x8x1xf32, #tpu.memory_space<vmem>>, vector<1x1x1x8x1xf32>
    %63 = vector.shape_cast %62 : vector<1x1x1x8x1xf32> to vector<8x1xf32>
    %64 = vector.shape_cast %63 : vector<8x1xf32> to vector<8x1xf32>
    %65 = vector.broadcast %64 : vector<8x1xf32> to vector<8x128xf32>
    %c0_71 = arith.constant 0 : index
    %c1_72 = arith.constant 1 : index
    %c3_73 = arith.constant 3 : index
    %c0_74 = arith.constant 0 : index
    %c0_75 = arith.constant 0 : index
    %66 = vector.load %arg3[%c0_71, %c1_72, %c3_73, %c0_74, %c0_75] : memref<1x2x4x8x1xf32, #tpu.memory_space<vmem>>, vector<1x1x1x8x1xf32>
    %67 = vector.shape_cast %66 : vector<1x1x1x8x1xf32> to vector<8x1xf32>
    %68 = vector.shape_cast %67 : vector<8x1xf32> to vector<8x1xf32>
    %69 = vector.broadcast %68 : vector<8x1xf32> to vector<8x128xf32>
    %70 = arith.mulf %65, %59 : vector<8x128xf32>
    %71 = arith.mulf %69, %61 : vector<8x128xf32>
    %72 = arith.addf %70, %71 : vector<8x128xf32>
    %73 = arith.mulf %65, %61 : vector<8x128xf32>
    %74 = arith.mulf %69, %59 : vector<8x128xf32>
    %75 = arith.subf %73, %74 : vector<8x128xf32>
    %76 = arith.addf %56, %72 : vector<8x128xf32>
    %77 = arith.addf %57, %75 : vector<8x128xf32>
    %c0_76 = arith.constant 0 : index
    %c0_77 = arith.constant 0 : index
    %c0_78 = arith.constant 0 : index
    %c0_79 = arith.constant 0 : index
    %78 = vector.load %arg5[%c0_76, %c0_77, %c0_78, %c0_79] : memref<1x2x8x128xf32, #tpu.memory_space<vmem>>, vector<1x1x8x128xf32>
    %79 = vector.shape_cast %78 : vector<1x1x8x128xf32> to vector<8x128xf32>
    %80 = vector.shape_cast %76 : vector<8x128xf32> to vector<1x1x8x128xf32>
    tpu.vector_store %arg5[%c0_76, %c0_77, %c0_78, %c0_79], %80 {strides = array<i32>} : memref<1x2x8x128xf32, #tpu.memory_space<vmem>>, vector<1x1x8x128xf32>,
    %c0_80 = arith.constant 0 : index
    %c1_81 = arith.constant 1 : index
    %c0_82 = arith.constant 0 : index
    %c0_83 = arith.constant 0 : index
    %81 = vector.load %arg5[%c0_80, %c1_81, %c0_82, %c0_83] : memref<1x2x8x128xf32, #tpu.memory_space<vmem>>, vector<1x1x8x128xf32>
    %82 = vector.shape_cast %81 : vector<1x1x8x128xf32> to vector<8x128xf32>
    %83 = vector.shape_cast %77 : vector<8x128xf32> to vector<1x1x8x128xf32>
    tpu.vector_store %arg5[%c0_80, %c1_81, %c0_82, %c0_83], %83 {strides = array<i32>} : memref<1x2x8x128xf32, #tpu.memory_space<vmem>>, vector<1x1x8x128xf32>,
    return
  }
  func.func @transform_0(%arg0: i32, %arg1: i32, %arg2: i32) -> (i32, i32, i32, i32, i32) {
    %c0_i32 = arith.constant 0 : i32
    %c0_i32_0 = arith.constant 0 : i32
    %c0_i32_1 = arith.constant 0 : i32
    %c0_i32_2 = arith.constant 0 : i32
    return %arg0, %c0_i32, %c0_i32_0, %arg1, %c0_i32_1 : i32, i32, i32, i32, i32
  }
  func.func @transform_1(%arg0: i32, %arg1: i32, %arg2: i32) -> (i32, i32, i32, i32, i32) {
    %c0_i32 = arith.constant 0 : i32
    %c0_i32_0 = arith.constant 0 : i32
    %c0_i32_1 = arith.constant 0 : i32
    return %arg0, %c0_i32, %c0_i32_0, %arg1, %arg2 : i32, i32, i32, i32, i32
  }
  func.func @transform_2(%arg0: i32, %arg1: i32, %arg2: i32) -> (i32, i32, i32, i32) {
    %c0_i32 = arith.constant 0 : i32
    %c0_i32_0 = arith.constant 0 : i32
    return %arg0, %c0_i32, %arg1, %arg2 : i32, i32, i32, i32
  }
}

</mosaic_0001>

<bundles_post_ra>
// kernel: tpu_custom_call.1
= control target key start
LH: loop header
LB: loop body
LE: loop exit
PB: predicated region body
PF: predicated region fallthrough
CT: control target
= control target key end

     0   :  { %s1111_s0 = inlined_call_operand.vmem [shape: f32[2,2,4,16,1], index: 0, kind: input, shape index: {}]   ;;  %s1112_s1 = inlined_call_operand.hbm [shape: f32[2,2,4,16,512], index: 1, kind: input, shape index: {}]   ;;  %s1113_s2 = inlined_call_operand.hbm [shape: f32[2,2,16,512], index: 2, kind: output, shape index: {}]  }
   0x1   :  { %1120 = sst [smem:[#allocation15_spill]] %s1111_s0 }
   0x2   :  { %7 = vsyncpa [#allocation4], 0 }
   0x3   :  { %9 = vsyncpa [#allocation4 + $0x1], 0 }
   0x4   :  { %10 = vsyncpa [#allocation5], 0 }
   0x5   :  { %12 = vsyncpa [#allocation5 + $0x1], 0  ;;  %s850_s9 = smov 0   ;;  %s852_s10 = smov 0  }
   0x6   :  { %s854_s11 = smov 0   ;;  %s856_s12 = smov 0  }
   0x7   :  { %s858_s13 = smov 0   ;;  %s860_s14 = smov 0  }
   0x8   :  { %s862_s15 = smov 0   ;;  %s864_s16 = smov 0  }
   0x9   :  { %s866_s17 = smov 0   ;;  %s868_s18 = smov 0  }
   0xa   :  { %s870_s19 = smov 0   ;;  %s872_s20 = smov 0  }
   0xb LB: > { %1121 = sst [smem:[#allocation9_spill]] %s796_s13  ;;  %s516_s21 = sadd.s32 4294967295, %s824_s20   ;;  %s824_s20 = sphi %s872_s20, %s18_s20   ;;  %s820_s19 = sphi %s870_s19, %s1147_s19   ;;  %s816_s18 = sphi %s868_s18, %s1139_s18   ;;  %s812_s17 = sphi %s866_s17, %s1146_s17   ;;  %s808_s16 = sphi %s864_s16, %s1145_s16   ;;  %s804_s15 = sphi %s862_s15, %s1137_s15   ;;  %s800_s14 = sphi %s860_s14, %s1144_s14   ;;  %s796_s13 = sphi %s858_s13, %s1136_s13   ;;  %s792_s12 = sphi %s856_s12, %s1135_s12   ;;  %s788_s11 = sphi %s854_s11, %s1143_s11   ;;  %s784_s10 = sphi %s852_s10, %s1142_s10   ;;  %s780_s9 = sphi %s850_s9, %s1141_s9  }
   0xc   : > { %1122 = sst [smem:[#allocation10_spill]] %s816_s18  ;;  %s517_s22 = sadd.s32 4294967294, %s824_s20  }
   0xd   : > { %s30_s23 = sadd.s32 1, %s812_s17  ;;  %s33_s24 = sadd.s32 1, %s816_s18 }
   0xe   : > { %p31_p0 = scmp.ge.s32.totalorder %s30_s23, 4  ;;  %s37_s25 = sadd.s32 1, %s820_s19 }
   0xf   : > { %p53_p1 = scmp.ne.s32.totalorder %s796_s13, %s792_s12  ;;  %s46_s26 = sadd.s32 1, %s796_s13 }
  0x10   : > { %s1149_s23 = smov (%p31_p0, %s30_s23), 0  ;;  %s1151_s24 = smov (!%p31_p0, %s33_s24), %s816_s18 }
  0x11   : > { %1123 = sst [smem:[#allocation11_spill]] %s1149_s23  ;;  %p54_p2 = scmp.eq.s32.totalorder %s824_s20, 0 }
  0x12   : > { %p35_p3 = scmp.ge.s32.totalorder %s1151_s24, 2  ;;  %s72_s27 = ssub.s32 %s812_s17, %s1149_s23 }
  0x13   : > { %p924_p4 = por %p54_p2, %p53_p1  ;;  %p83_p5 = scmp.ne.s32.totalorder %s788_s11, %s784_s10 }
  0x14   : > { %s1153_s24 = smov (%p35_p3, %s1151_s24), 0  ;;  %s1155_s25 = smov (!%p35_p3, %s37_s25), %s820_s19 }
  0x15   : > { %1125 = sst [smem:[#allocation12_spill]] %s1153_s24  ;;  %s42_s29 = ssub.s32 %s816_s18, %s1153_s24 }
  0x16   : > { %p935_p6 = por %p83_p5, %p54_p2  ;;  %p39_p7 = scmp.ge.s32.totalorder %s1155_s25, 2 }
  0x17   : > { %p89_p8 = scmp.ne.s32.totalorder %s784_s10, %s780_s9  ;;  %p90_p9 = scmp.eq.s32.totalorder %s516_s21, 0 }
  0x18   : > { %p117_p10 = scmp.eq.s32.totalorder %s516_s21, 15  ;;  %s1157_s25 = smov (%p39_p7, %s1155_s25), 0 }
  0x19   : > { %1127 = sst [smem:[#allocation13_spill]] %s1157_s25  ;;  %p946_p11 = por %p90_p9, %p89_p8 }
  0x1a   : > { %p950_p12 = por %p117_p10, %p83_p5  ;;  %s41_s5 = ssub.s32 %s820_s19, %s1157_s25 }
  0x1b   : > { %p123_p13 = scmp.eq.s32.totalorder %s517_s22, 15  ;;  %s43_s6 = sor.u32 %s42_s29, %s41_s5 }
  0x1c   : > { %s1129_s4 = scalar_select %p950_p12, 1, 0 }
  0x1d   : > { %s76_s7 = sadd.s32 1, %s788_s11  ;;  %p44_p0 = scmp.eq.s32.totalorder %s43_s6, 0 }
  0x1e   : > { %s73_s8 = sor.u32 %s72_s27, %s43_s6  ;;  %p960_p2 = por %p123_p13, %p89_p8 }
  0x1f   : > { %p74_p1 = scmp.eq.s32.totalorder %s73_s8, 0  ;;  %p519_p3 = scmp.ge.s32.totalorder %s824_s20, 16 }
  0x20   : > { %s1130_s21 = scalar_select %p960_p2, 1, 0 }
  0x21   : > { %s965_s24 = scalar_select %p44_p0, %s796_s13, %s46_s26  }
  0x22   : > { %s968_s23 = scalar_select %p74_p1, %s788_s11, %s76_s7  }
  0x23   : > { %1131 = sst [smem:[#allocation14_spill]] %s965_s24  ;;  %139 = sbr.rel (%p519_p3) target bundleno = 85 (0x55), region = 16 }
  0x2a   : > { %142 = sbr.rel (!%p924_p4) target bundleno = 56 (0x38), region = 20  ;;  %s144_s22 = sand.u32 (%p924_p4), 1, %s796_s13  }
  0x2b   : > { %s521_s27 = sshll.u32 (%p924_p4), %s820_s19, 4  ;;  %s520_s29 = sshll.u32 (%p924_p4), %s144_s22, 6 }
  0x2c   : > { %s148_s5 = sadd.s32 (%p924_p4), %s816_s18, %s521_s27  ;;  %s1132_s0 = sld [smem:[#allocation15_spill]] (%p924_p4) }
  0x2d   : > { %s522_s6 = sshll.u32 (%p924_p4), %s148_s5, 3  ;;  %s146_s7 = scalar_lea.vmem (%p924_p4), [#allocation2], %s520_s29 }
  0x32   : > { %s150_s26 = scalar_lea.vmem %s1132_s0, %s522_s6 }
  0x33   : > { %v192_v0 = vld [vmem:[%s150_s26] sm:$0xff]  ;;  %v194_v1 = vld [vmem:[%s150_s26 + $0x10] sm:$0xff] }
  0x34   : > { %v196_v2 = vld [vmem:[%s150_s26 + $0x20] sm:$0xff]  ;;  %193 = vst [vmem:[%s146_s7] sm:$0xff] %v192_v0  ;;  %195 = vst [vmem:[%s146_s7 + $0x8] sm:$0xff] %v194_v1  ;;  %v198_v3 = vld [vmem:[%s150_s26 + $0x30] sm:$0xff] }
  0x35   : > { %197 = vst [vmem:[%s146_s7 + $0x10] sm:$0xff] %v196_v2  ;;  %v200_v4 = vld [vmem:[%s150_s26 + $0x40] sm:$0xff]  ;;  %v202_v5 = vld [vmem:[%s150_s26 + $0x50] sm:$0xff]  ;;  %199 = vst [vmem:[%s146_s7 + $0x18] sm:$0xff] %v198_v3 }
  0x36   : > { %201 = vst [vmem:[%s146_s7 + $0x20] sm:$0xff] %v200_v4  ;;  %203 = vst [vmem:[%s146_s7 + $0x28] sm:$0xff] %v202_v5  ;;  %v204_v6 = vld [vmem:[%s150_s26 + $0x60] sm:$0xff]  ;;  %v206_v7 = vld [vmem:[%s150_s26 + $0x70] sm:$0xff] }
  0x37   : > { %205 = vst [vmem:[%s146_s7 + $0x30] sm:$0xff] %v204_v6  ;;  %207 = vst [vmem:[%s146_s7 + $0x38] sm:$0xff] %v206_v7 }
  0x38 PF: > { %s214_s25 = sand.u32 1, %s788_s11   ;;  %s524_s28 = sshll.u32 %s816_s18, 2 }
  0x39   : > { %s523_s22 = sshll.u32 %s214_s25, 6  ;;  %s223_s27 = sadd.s32 %s812_s17, %s524_s28 }
  0x3a   : > { %s525_s29 = sshll.u32 %s820_s19, 6  ;;  %s218_s5 = scalar_lea.vmem [#allocation3], %s523_s22 }
  0x3b   : > { %s228_s6 = sshll.u32 %s218_s5, 4  ;;  %s225_s8 = sadd.s32 %s525_s29, %s223_s27  ;;  %s983_s6 = int_to_ptr.vmem [resolvable:$true] %s228_s6 }
  0x3c   : > { %s526_s0 = sshll.u32 %s225_s8, 7  ;;  %s990_s13 = scalar_lea.sflag [#allocation4], %s214_s25 }
  0x3d   : > { %s988_s7 = scalar_lea.hbm %s1112_s1, %s526_s0  ;;  %s670_s27 = scalar_lea.hbm %s1112_s1, 16384 }
  0x3e   : > { %s666_s18 = scalar_lea.hbm %s988_s7, 1024  ;;  %p671_p8 = scmp.lt.u32.totalorder %s988_s7, %s1112_s1 }
  0x3f   : > { %p667_p4 = scmp.ne.s32.totalorder %s988_s7, %s666_s18  ;;  %p672_p9 = scmp.lt.u32.totalorder %s670_s27, %s666_s18 }
  0x40   : > { %p674_p13 = scmp.lt.u32.totalorder %s666_s18, %s988_s7 }
  0x41   : > { %p668_p5 = pnand %p667_p4, %p935_p6  ;;  %p673_p10 = por %p672_p9, %p671_p8 }
  0x43   : > { %p669_p7 = pneg %p668_p5  ;;  %p675_p0 = por %p674_p13, %p673_p10 }
  0x45   : > { %p676_p1 = pnand %p675_p0, %p669_p7 }
  0x47   : > { %679 = shalt.err (!%p676_p1)
}
  0x48   : > { %s680_s0 = scalar_lea.vmem %s983_s6, 1024  ;;  %s826_s24 = smov [#allocation3]  }
  0x49   : > { %p681_p3 = scmp.ne.s32.totalorder %s983_s6, %s680_s0  ;;  %s684_s25 = sshll.u32 %s826_s24, 4  ;;  %s685_s25 = int_to_ptr.vmem [resolvable:$false] %s684_s25 }
  0x4a   : > { %s686_s8 = scalar_lea.vmem %s685_s25, 2048  ;;  %p687_p2 = scmp.lt.s32.totalorder %s983_s6, %s685_s25 }
  0x4b   : > { %p682_p4 = pnand %p681_p3, %p935_p6  ;;  %p688_p12 = scmp.lt.s32.totalorder %s686_s8, %s680_s0 }
  0x4d   : > { %p683_p5 = pneg %p682_p4  ;;  %p689_p8 = por %p688_p12, %p687_p2 }
  0x4f   : > { %p690_p9 = pnand %p689_p8, %p683_p5 }
  0x51   : > { %693 = shalt.err (!%p690_p9)
}
  0x52   : > { %s827_s18 = smov 1024   ;;  %s828_s26 = smov 128  }
  0x53   : > { %s829_s28 = smov 8  }
  0x54   : > { %552 = dma.hbm_to_vmem [thread:$0]  (%p935_p6), %s988_s7, 1024, %s983_s6, %s990_s13, %s827_s18, %s828_s26, %s829_s28  }
  0x55 PF: > { %p527_p7 = scmp.ge.s32.totalorder %s824_s20, 1  ;;  %p236_p10 = scmp.lt.s32.totalorder %s824_s20, 17 }
  0x57   : > { %p237_p13 = pnand %p527_p7, %p236_p10 }
  0x58   : > { %s243_s22 = sand.u32 (!%p237_p13), 1, %s792_s12   ;;  %s1018_s27 = sand.u32 (!%p237_p13), 1, %s784_s10  }
  0x59   : > { %240 = sbr.rel (%p237_p13) target bundleno = 261 (0x105), region = 62  ;;  %s528_s29 = sshll.u32 (!%p237_p13), %s243_s22, 6 }
  0x5a   : > { %s529_s5 = sshll.u32 (!%p237_p13), %s1018_s27, 6  ;;  %s245_s0 = scalar_lea.vmem (!%p237_p13), [#allocation2], %s528_s29 }
  0x5b   : > { %s250_s30 = scalar_lea.sflag (!%p237_p13), [#allocation4], %s1018_s27  ;;  %s1022_s13 = scalar_lea.vmem (!%p237_p13), [#allocation3], %s529_s5 }
  0x60   : > { %771 = dma.done.wait (%p946_p11), %s250_s30, 1024  }
  0x61   : > { %773 = vsyncadd (%p946_p11), %s250_s30, 4294966272  ;;  %v830_v8 = vmov 0   ;;  %v535_v9 = vld [vmem:[%s245_s0 + $0x8] sm:$0xff]  ;;  %v281_v10 = vld [vmem:[%s245_s0] sm:$0xff]  ;;  %s547_s12 = sshll.u32 %s804_s15, 2  ;;  %s530_s3 = sshll.u32 %s1018_s27, 4 }
  0x62   : > { %665 = vset.pattern.permute.xlu1 %v830_v8  ;;  %664 = vset.pattern.permute.xlu0 %v830_v8  ;;  %v536_v11 = vld [vmem:[%s245_s0 + $0x28] sm:$0xff]  ;;  %v532_v12 = vld [vmem:[%s245_s0 + $0x20] sm:$0xff]  ;;  %v540_v13 = vld [vmem:[%s245_s0 + $0x30] sm:$0xff]  ;;  %s393_s6 = sadd.s32 %s800_s14, %s547_s12  ;;  %s548_s7 = sshll.u32 %s808_s16, 4 }
  0x63   : > { %308 = vperm.xlu1 %665, %v535_v9   ;;  %284 = vperm.xlu0 %664, %v281_v10   ;;  %v539_v14 = vld [vmem:[%s245_s0 + $0x10] sm:$0xff]  ;;  %v544_v15 = vld [vmem:[%s245_s0 + $0x38] sm:$0xff]  ;;  %v533_v19 = vld [vmem:[%s1022_s13 + $0x8] sm:$0xff]  ;;  %s395_s15 = sadd.s32 %s548_s7, %s393_s6  ;;  %s277_s14 = scalar_lea.vmem [#allocation6], %s530_s3 }
  0x64   : > { %v543_v16 = vld [vmem:[%s245_s0 + $0x18] sm:$0xff]  ;;  %v534_v20 = vld [vmem:[%s1022_s13 + $0x28] sm:$0xff]  ;;  %v278_v21 = vld [vmem:[%s1022_s13] sm:$0xff]  ;;  %s398_s16 = sshll.u32 %s277_s14, 4  ;;  %s549_s24 = sshll.u32 %s395_s15, 7  ;;  %s1040_s16 = int_to_ptr.vmem [resolvable:$true] %s398_s16 }
  0x65   : > { %v531_v22 = vld [vmem:[%s1022_s13 + $0x20] sm:$0xff]  ;;  %v537_v33 = vld [vmem:[%s1022_s13 + $0x10] sm:$0xff]  ;;  %v541_v45 = vld [vmem:[%s1022_s13 + $0x18] sm:$0xff]  ;;  %s1045_s18 = scalar_lea.hbm %s1113_s2, %s549_s24  ;;  %s382_s26 = scalar_lea.sflag [#allocation5], %s1018_s27 }
  0x66   : > { %v538_v34 = vld [vmem:[%s1022_s13 + $0x30] sm:$0xff]  ;;  %v542_v46 = vld [vmem:[%s1022_s13 + $0x38] sm:$0xff]  ;;  %s694_s28 = scalar_lea.vmem %s1040_s16, 256  ;;  %p1133_p11 = scmp.ne.s32.totalorder %s1129_s4, 0 }
  0x67   : > { %315 = vperm.xlu1 %665, %v536_v11   ;;  %291 = vperm.xlu0 %664, %v532_v12   ;;  %p695_p6 = scmp.ne.s32.totalorder %s1040_s16, %s694_s28  ;;  %s831_s22 = smov [#allocation6]  }
  0x68   : > { %s698_s29 = sshll.u32 %s831_s22, 4  ;;  %s699_s29 = int_to_ptr.vmem [resolvable:$false] %s698_s29 }
  0x69   : > { %p696_p12 = pnand %p695_p6, %p1133_p11  ;;  %s700_s5 = scalar_lea.vmem %s699_s29, 512 }
  0x6a   : > { %p701_p0 = scmp.lt.s32.totalorder %s1040_s16, %s699_s29  ;;  %p702_p1 = scmp.lt.s32.totalorder %s700_s5, %s694_s28 }
  0x6b   : > { %341 = vperm.xlu1 %665, %v540_v13   ;;  %334 = vperm.xlu0 %664, %v539_v14   ;;  %p697_p2 = pneg %p696_p12 }
  0x6c   : > { %p703_p3 = por %p702_p1, %p701_p0 }
  0x6e   : > { %p704_p4 = pnand %p703_p3, %p697_p2 }
  0x6f   : > { %367 = vperm.xlu1 %665, %v544_v15   ;;  %360 = vperm.xlu0 %664, %v543_v16  }
  0xe2   : > { %v309_v17 = vpop.permute.xlu1 %308  ;;  %v285_v18 = vpop.permute.xlu0 %284 }
  0xe3   : > { %v318_v29 = vmul.f32 %v533_v19, %v309_v17  ;;  %v321_v30 = vmul.f32 %v534_v20, %v309_v17  ;;  %v294_v31 = vmul.f32 %v285_v18, %v278_v21  ;;  %v297_v32 = vmul.f32 %v531_v22, %v285_v18 }
  0xe6   : > { %v316_v23 = vpop.permute.xlu1 %315  ;;  %v292_v24 = vpop.permute.xlu0 %291 }
  0xe7   : > { %v319_v25 = vmul.f32 %v534_v20, %v316_v23  ;;  %v322_v26 = vmul.f32 %v533_v19, %v316_v23  ;;  %v295_v27 = vmul.f32 %v531_v22, %v292_v24  ;;  %v298_v28 = vmul.f32 %v292_v24, %v278_v21 }
  0xe9   : > { %v320_v35 = vadd.f32 %v319_v25, %v318_v29  ;;  %v323_v36 = vsub.f32 %v321_v30, %v322_v26  ;;  %v296_v37 = vadd.f32 %v295_v27, %v294_v31  ;;  %v299_v38 = vsub.f32 %v297_v32, %v298_v28 }
  0xea   : > { %v342_v39 = vpop.permute.xlu1 %341  ;;  %v335_v40 = vpop.permute.xlu0 %334 }
  0xeb   : > { %v345_v41 = vmul.f32 %v538_v34, %v342_v39  ;;  %v348_v42 = vmul.f32 %v537_v33, %v342_v39  ;;  %v344_v43 = vmul.f32 %v537_v33, %v335_v40  ;;  %v347_v44 = vmul.f32 %v538_v34, %v335_v40 }
  0xec   : > { %v324_v47 = vadd.f32 %v320_v35, %v296_v37  ;;  %v325_v48 = vadd.f32 %v323_v36, %v299_v38 }
  0xed   : > { %v346_v49 = vadd.f32 %v345_v41, %v344_v43  ;;  %v349_v50 = vsub.f32 %v347_v44, %v348_v42 }
  0xee   : > { %v368_v51 = vpop.permute.xlu1 %367  ;;  %v361_v52 = vpop.permute.xlu0 %360 }
  0xef   : > { %v371_v53 = vmul.f32 %v542_v46, %v368_v51  ;;  %v374_v54 = vmul.f32 %v541_v45, %v368_v51  ;;  %v370_v55 = vmul.f32 %v541_v45, %v361_v52  ;;  %v373_v56 = vmul.f32 %v542_v46, %v361_v52 }
  0xf0   : > { %v350_v57 = vadd.f32 %v346_v49, %v324_v47  ;;  %v351_v58 = vadd.f32 %v349_v50, %v325_v48 }
  0xf1   : > { %v372_v59 = vadd.f32 %v371_v53, %v370_v55  ;;  %v375_v60 = vsub.f32 %v373_v56, %v374_v54 }
  0xf3   : > { %v376_v61 = vadd.f32 %v372_v59, %v350_v57  ;;  %v377_v62 = vadd.f32 %v375_v60, %v351_v58 }
  0xf5   : > { %378 = vst [vmem:[%s277_s14] sm:$0xff] %v376_v61  ;;  %545 = vst [vmem:[%s277_s14 + $0x8] sm:$0xff] %v377_v62 }
  0xf6   : > { %707 = shalt.err (!%p704_p4)
}
  0xf7   : > { %s708_s0 = scalar_lea.hbm %s1045_s18, 256  ;;  %s712_s12 = scalar_lea.hbm %s1113_s2, 4096 }
  0xf8   : > { %p709_p5 = scmp.ne.s32.totalorder %s1045_s18, %s708_s0  ;;  %p713_p7 = scmp.lt.u32.totalorder %s1045_s18, %s1113_s2 }
  0xf9   : > { %p714_p10 = scmp.lt.u32.totalorder %s712_s12, %s708_s0  ;;  %p716_p6 = scmp.lt.u32.totalorder %s708_s0, %s1045_s18 }
  0xfa   : > { %p710_p8 = pnand %p709_p5, %p1133_p11 }
  0xfb   : > { %p715_p13 = por %p714_p10, %p713_p7 }
  0xfc   : > { %p711_p9 = pneg %p710_p8 }
  0xfd   : > { %p717_p12 = por %p716_p6, %p715_p13 }
  0xff   : > { %p718_p2 = pnand %p717_p12, %p711_p9 }
 0x101   : > { %721 = shalt.err (!%p718_p2)
}
 0x102   : > { %s832_s7 = smov 128   ;;  %s833_s15 = smov 1024  }
 0x103   : > { %s834_s14 = smov 8  }
 0x104   : > { %554 = dma.vmem_to_hbm [thread:$0]  (%p1133_p11), %s1040_s16, 256, %s1045_s18, %s382_s26, %s832_s7, %s833_s15, %s834_s14  }
 0x105 PF: > { %p560_p0 = scmp.ge.s32.totalorder %s824_s20, 2  ;;  %s413_s24 = sand.u32 1, %s780_s9  }
 0x106   : > { %p1134_p1 = scmp.ne.s32.totalorder %s1130_s21, 0  ;;  %s414_s25 = scalar_lea.sflag [#allocation5], %s413_s24 }
 0x108   : > { %p557_p3 = pnand %p560_p0, %p1134_p1 }
 0x10a   : > { %775 = dma.done.wait (!%p557_p3), %s414_s25, 256  }
 0x10b   : > { %777 = vsyncadd (!%p557_p3), %s414_s25, 4294967040  ;;  %s18_s20 = sadd.s32 1, %s824_s20   ;;  %s1135_s12 = sld [smem:[#allocation9_spill]] }
 0x10c   : > { %p15_p4 = scmp.ge.s32.totalorder %s18_s20, 18   ;;  %s1136_s13 = sld [smem:[#allocation14_spill]] }
 0x10d   : > { %s1137_s15 = sld [smem:[#allocation10_spill]]  ;;  %s1138_s4 = sld [smem:[#allocation11_spill]] }
 0x10e   : > { %s1139_s18 = sld [smem:[#allocation12_spill]]  ;;  %s1140_s27 = sld [smem:[#allocation13_spill]] }
 0x10f   : > { %s1141_s9 = smov %s784_s10  ;;  %s1142_s10 = smov %s788_s11 }
 0x110   : > { %s1143_s11 = smov %s968_s23  ;;  %s1144_s14 = smov %s812_s17 }
 0x111   : > { %s1145_s16 = smov %s820_s19  ;;  %17 = sbr.rel (!%p15_p4) target bundleno = 11 (0xb), region = 134 }
 0x113   : > { %s1146_s17 = smov %s1138_s4 }
 0x114   : > { %s1147_s19 = smov %s1140_s27 }
 0x118   :  { %419 = vsyncpa [#allocation4], 1 }
 0x119   :  { %421 = vsyncpa [#allocation4 + $0x1], 1 }
 0x11a   :  { %422 = vsyncpa [#allocation5], 1 }
 0x11b   :  { %424 = vsyncpa [#allocation5 + $0x1], 1 }

</bundles_post_ra>
